<compile_context>
chip_gen: v5e
topology: v5e:2x2
jax: 0.10.0
libtpu: 0.0.40
codegen_flags: <defaults>
</compile_context>

<pallas_src>
import jax
import jax.numpy as jnp
from jax.experimental import pallas as pl
from jax.experimental.pallas import tpu as pltpu


def _identity_dma_kernel(x_ref, o_ref, sem):
    # Whole-slab HBM -> HBM DMA; no VMEM / vreg round-trip, no tiling.
    cp = pltpu.make_async_copy(x_ref, o_ref, sem)
    cp.start()
    cp.wait()


def identical_pool(x: jax.Array, batch: jax.Array | None = None) -> jax.Array:
    """Pallas equivalent of IdenticalPool.forward(x, batch) == x.

    `batch` is accepted for API parity but (like the PyTorch module) ignored.
    Works for any shape / dtype since the whole contiguous slab is copied by a
    single DMA.
    """
    del batch  # unused, matches the reference module
    nbytes = x.size * x.dtype.itemsize
    return pl.pallas_call(
        _identity_dma_kernel,
        out_shape=jax.ShapeDtypeStruct(x.shape, x.dtype),
        in_specs=[pl.BlockSpec(memory_space=pl.ANY)],   # raw HBM ref, no auto-DMA
        out_specs=pl.BlockSpec(memory_space=pl.ANY),    # raw HBM ref, DMA target
        scratch_shapes=[pltpu.SemaphoreType.DMA(())],
        cost_estimate=pl.CostEstimate(
            flops=0, transcendentals=0, bytes_accessed=2 * nbytes),
    )(x)


if __name__ == "__main__":
    import numpy as np

    key = jax.random.PRNGKey(0)
    k_x, k_b = jax.random.split(key)

    num_nodes, hidden = 8, 32
    x = jax.random.normal(k_x, (num_nodes, hidden), dtype=jnp.float32)
    # node -> graph assignment vector (unused by the forward, kept for parity)
    batch = jax.random.randint(k_b, (num_nodes,), 0, 2, dtype=jnp.int32)

    # Host-side reference copy.
    x_host = np.asarray(x)

    out = jax.block_until_ready(identical_pool(x, batch))
    assert out.shape == x_host.shape and out.dtype == x_host.dtype
    assert np.array_equal(np.asarray(out), x_host)

    print("KERNEL_OK")
</pallas_src>

<mosaic_0001>
module attributes {stable_mosaic.version = 11 : i64} {
  func.func @_identity_dma_kernel(%arg0: memref<8x32xf32, #tpu.memory_space<any>>, %arg1: memref<8x32xf32, #tpu.memory_space<any>>, %arg2: memref<!tpu.dma_semaphore, #tpu.memory_space<semaphore_mem>>) attributes {dimension_semantics = [], scalar_prefetch = 0 : i64, scratch_operands = 1 : i64, tpu.core_type = #tpu.core_type<tc>} {
    tpu.enqueue_dma source(%arg0 : memref<8x32xf32, #tpu.memory_space<any>>) target(%arg1 : memref<8x32xf32, #tpu.memory_space<any>>) target_semaphore(%arg2 : memref<!tpu.dma_semaphore, #tpu.memory_space<semaphore_mem>>)
    tpu.wait_dma2 semaphore(%arg2 : memref<!tpu.dma_semaphore, #tpu.memory_space<semaphore_mem>>) src(%arg0 : memref<8x32xf32, #tpu.memory_space<any>>) dst(%arg1 : memref<8x32xf32, #tpu.memory_space<any>>)
    return
  }
}

</mosaic_0001>

<bundles_post_ra>
// kernel: tpu_custom_call.1
= control target key start
LH: loop header
LB: loop body
LE: loop exit
PB: predicated region body
PF: predicated region fallthrough
CT: control target
= control target key end

     0   :  { %s32_s12 = smov [#allocation2]   ;;  %s33_s13 = smov [#allocation3]   ;;  %s51_s0 = inlined_call_operand.hbm [shape: f32[8,32], index: 0, kind: input, shape index: {}]   ;;  %s52_s1 = inlined_call_operand.hbm [shape: f32[8,32], index: 1, kind: output, shape index: {}]  }
   0x1   :  { %s10_s8 = sshll.u32 %s51_s0, 4  ;;  %s12_s11 = sshll.u32 %s52_s1, 4  ;;  %s11_s8 = int_to_ptr.hbm [resolvable:$true] %s10_s8  ;;  %s13_s11 = int_to_ptr.hbm [resolvable:$true] %s12_s11 }
   0x2   :  { %s34_s14 = smov 0  }
   0x3   :  { %16 = dma.general %s11_s8, 128, %s13_s11, %s32_s12, %s33_s13, [#allocation4], %s34_s14, 0  }
   0x4   :  { %30 = dma.done.wait [#allocation2], 128 }
   0x5   :  { %31 = vsyncadd [#allocation2], 4294967168 }
   0x6   :  { %20 = vsyncmov [#allocation2] }
   0x9   :  { %s21_s15 = vpop.sfrf %20 }
   0xa   :  { %p26_p0 = scmp.ne.s32.totalorder %s21_s15, 0 }
   0xc   :  { %25 = shalt.err (%p26_p0)  }

</bundles_post_ra>
